<compile_context>
chip_gen: v7x
topology: tpu7x:2x2x1
jax: 0.10.0
libtpu: 0.0.40
codegen_flags: <defaults>
</compile_context>

<pallas_src>
import functools

import jax
import jax.numpy as jnp
from jax.experimental import pallas as pl
from jax.experimental.pallas import tpu as pltpu


def _nn_dirichlet_kernel(n_layers, *refs):
    """Fused MLP + Dirichlet distance-function kernel (feature-major layout).

    refs = (x_ref, w0_ref, b0_ref, ..., w_{L-1}_ref, b_{L-1}_ref, out_ref)
      x_ref:   (F_in, TB)        one batch tile, batch on lanes
      w_i:     (F_out_i, F_in_i) VMEM-resident across all grid steps
      b_i:     (F_out_i, 1)
      out_ref: (F_out_last, TB)  lane-dense store
    """
    x_ref = refs[0]
    out_ref = refs[-1]
    param_refs = refs[1:-1]  # alternating W, b

    x = x_ref[...]  # (F_in, TB) float32

    # Dirichlet distance function: prod over features of x*(1-x).
    # Feature axis is the sublane axis and is always a full (never partial)
    # block, so the product never mixes in batch-padding columns' features.
    # Unrolled static-slice product (small static F_in) — guaranteed lowering,
    # cheap VPU filler under the matmul/store bottleneck.
    # TODO(synk): f32 product over many features can underflow near the domain
    # boundary; the original module runs in double.
    t = x * (1.0 - x)                       # (F_in, TB)
    dist = t[0:1, :]
    for j in range(1, t.shape[0]):
        dist = dist * t[j:j + 1, :]         # (1, TB)

    h = x
    for i in range(n_layers):
        w = param_refs[2 * i][...]          # (F_out_i, F_in_i)
        b = param_refs[2 * i + 1][...]      # (F_out_i, 1)
        y = jnp.dot(w, h, preferred_element_type=jnp.float32) + b  # (F_out_i, TB)
        if i < n_layers - 1:
            h = jnp.maximum(y, 0.0)         # ReLU on hidden layers
        else:
            h = y                           # last layer: no activation

    out_ref[...] = dist * h                 # (F_out_last, TB), sublane-broadcast


def nn_dirichlet_forward(x, params, *, batch_tile=512):
    """x: (B, F_in) float32.  params: list of (W (out, in), b (out, 1)) float32.

    Returns (B, F_out_last) float32, matching NN_dirichlet.forward semantics.
    """
    B, f_in = x.shape
    n_layers = len(params)
    out_dim = params[-1][0].shape[0]

    # Batch tile: a multiple of 128 (lane width), capped to the padded batch.
    tb = min(batch_tile, pl.cdiv(B, 128) * 128)
    tb = max(128, (tb // 128) * 128)
    b_pad = pl.cdiv(B, tb) * tb
    grid = (b_pad // tb,)

    # Feature-major layout: (F_in, B_pad), batch on lanes.  Pad with 0.5 (the
    # padded columns are sliced off at the end; every output column depends
    # only on its own input column, so padding cannot contaminate real rows).
    x_t = jnp.pad(x, ((0, b_pad - B), (0, 0)), constant_values=0.5).T

    flat_inputs = [x_t]
    in_specs = [pl.BlockSpec((f_in, tb), lambda i: (0, i))]
    for w, b in params:
        flat_inputs += [w, b]
        in_specs += [
            pl.BlockSpec(w.shape, lambda i: (0, 0)),  # DMA once, stays resident
            pl.BlockSpec(b.shape, lambda i: (0, 0)),
        ]

    kernel = functools.partial(_nn_dirichlet_kernel, n_layers)

    out_t = pl.pallas_call(
        kernel,
        out_shape=jax.ShapeDtypeStruct((out_dim, b_pad), x.dtype),
        grid=grid,
        in_specs=in_specs,
        out_specs=pl.BlockSpec((out_dim, tb), lambda i: (0, i)),
        compiler_params=pltpu.CompilerParams(
            dimension_semantics=("parallel",),        # v7x: shard across 2 TCs
            vmem_limit_bytes=48 * 1024 * 1024,        # headroom under v7x 64 MiB
        ),
    )(*flat_inputs)

    return out_t.T[:B]


def init_params(key, nn_list, dtype=jnp.float32):
    """torch.nn.Linear-style init (uniform +-1/sqrt(fan_in)); W stored (out, in)."""
    params = []
    for i in range(len(nn_list) - 1):
        fan_in, fan_out = nn_list[i], nn_list[i + 1]
        key, kw, kb = jax.random.split(key, 3)
        bound = 1.0 / (fan_in ** 0.5)
        w = jax.random.uniform(kw, (fan_out, fan_in), dtype, minval=-bound, maxval=bound)
        b = jax.random.uniform(kb, (fan_out, 1), dtype, minval=-bound, maxval=bound)
        params.append((w, b))
    return params


def reference_forward(x, params):
    """Pure-JAX reference (row-major convention) for verification."""
    dist = jnp.prod(x * (1.0 - x), axis=-1, keepdims=True)
    h = x
    for i, (w, b) in enumerate(params):
        y = h @ w.T + b[:, 0]
        h = jnp.maximum(y, 0.0) if i < len(params) - 1 else y
    return dist * h


if __name__ == "__main__":
    key = jax.random.PRNGKey(0)

    # Architecture consistent with Dense_NN(nn_list): 16 -> 32 -> 32 -> 8.
    nn_list = [16, 32, 32, 8]
    batch = 200   # deliberately not a multiple of the tile: exercises pad+slice

    key, kx = jax.random.split(key)
    # Inputs in (0,1) so the Dirichlet distance function is meaningful.
    x = jax.random.uniform(kx, (batch, nn_list[0]), jnp.float32)
    params = init_params(key, nn_list)

    # batch_tile=128 -> grid of 2 steps at this small demo batch; use
    # batch_tile≈8192-32768 for production-size batches.
    out = nn_dirichlet_forward(x, params, batch_tile=128)
    out = jax.block_until_ready(out)

    ref = reference_forward(x, params)
    assert out.shape == (batch, nn_list[-1])
    err = float(jnp.max(jnp.abs(out - ref)))
    scale = float(jnp.max(jnp.abs(ref))) + 1e-30
    assert err <= 1e-4 * scale, f"Pallas output mismatch: max err {err}, scale {scale}"

    print("KERNEL_OK")
</pallas_src>

<mosaic_0001>
module attributes {stable_mosaic.version = 11 : i64} {
  func.func @_nn_dirichlet_kernel(%arg0: i32, %arg1: memref<16x128xf32, #tpu.memory_space<vmem>>, %arg2: memref<32x16xf32, #tpu.memory_space<vmem>>, %arg3: memref<32x1xf32, #tpu.memory_space<vmem>>, %arg4: memref<32x32xf32, #tpu.memory_space<vmem>>, %arg5: memref<32x1xf32, #tpu.memory_space<vmem>>, %arg6: memref<8x32xf32, #tpu.memory_space<vmem>>, %arg7: memref<8x1xf32, #tpu.memory_space<vmem>>, %arg8: memref<8x128xf32, #tpu.memory_space<vmem>>) attributes {dimension_semantics = [#tpu.dimension_semantics<parallel>], iteration_bounds = array<i64: 2>, scalar_prefetch = 0 : i64, scratch_operands = 0 : i64, tpu.core_type = #tpu.core_type<tc>, window_params = [{transform_indices = @transform_0, window_bounds = array<i64: 16, 128>}, {pipeline_mode = #tpu.pipeline_mode<synchronous>, transform_indices = @transform_1, window_bounds = array<i64: 32, 16>}, {pipeline_mode = #tpu.pipeline_mode<synchronous>, transform_indices = @transform_2, window_bounds = array<i64: 32, 1>}, {pipeline_mode = #tpu.pipeline_mode<synchronous>, transform_indices = @transform_3, window_bounds = array<i64: 32, 32>}, {pipeline_mode = #tpu.pipeline_mode<synchronous>, transform_indices = @transform_4, window_bounds = array<i64: 32, 1>}, {pipeline_mode = #tpu.pipeline_mode<synchronous>, transform_indices = @transform_5, window_bounds = array<i64: 8, 32>}, {pipeline_mode = #tpu.pipeline_mode<synchronous>, transform_indices = @transform_6, window_bounds = array<i64: 8, 1>}, {transform_indices = @transform_7, window_bounds = array<i64: 8, 128>}]} {
    %c0 = arith.constant 0 : index
    %c0_0 = arith.constant 0 : index
    %0 = vector.load %arg1[%c0, %c0_0] : memref<16x128xf32, #tpu.memory_space<vmem>>, vector<16x128xf32>
    %cst = arith.constant 1.000000e+00 : f32
    %1 = vector.broadcast %cst : f32 to vector<16x128xf32>
    %2 = arith.subf %1, %0 : vector<16x128xf32>
    %3 = arith.mulf %0, %2 : vector<16x128xf32>
    %4 = vector.extract_strided_slice %3 {offsets = [0, 0], sizes = [1, 128], strides = [1, 1]} : vector<16x128xf32> to vector<1x128xf32>
    %5 = vector.extract_strided_slice %3 {offsets = [1, 0], sizes = [1, 128], strides = [1, 1]} : vector<16x128xf32> to vector<1x128xf32>
    %6 = arith.mulf %4, %5 : vector<1x128xf32>
    %7 = vector.extract_strided_slice %3 {offsets = [2, 0], sizes = [1, 128], strides = [1, 1]} : vector<16x128xf32> to vector<1x128xf32>
    %8 = arith.mulf %6, %7 : vector<1x128xf32>
    %9 = vector.extract_strided_slice %3 {offsets = [3, 0], sizes = [1, 128], strides = [1, 1]} : vector<16x128xf32> to vector<1x128xf32>
    %10 = arith.mulf %8, %9 : vector<1x128xf32>
    %11 = vector.extract_strided_slice %3 {offsets = [4, 0], sizes = [1, 128], strides = [1, 1]} : vector<16x128xf32> to vector<1x128xf32>
    %12 = arith.mulf %10, %11 : vector<1x128xf32>
    %13 = vector.extract_strided_slice %3 {offsets = [5, 0], sizes = [1, 128], strides = [1, 1]} : vector<16x128xf32> to vector<1x128xf32>
    %14 = arith.mulf %12, %13 : vector<1x128xf32>
    %15 = vector.extract_strided_slice %3 {offsets = [6, 0], sizes = [1, 128], strides = [1, 1]} : vector<16x128xf32> to vector<1x128xf32>
    %16 = arith.mulf %14, %15 : vector<1x128xf32>
    %17 = vector.extract_strided_slice %3 {offsets = [7, 0], sizes = [1, 128], strides = [1, 1]} : vector<16x128xf32> to vector<1x128xf32>
    %18 = arith.mulf %16, %17 : vector<1x128xf32>
    %19 = vector.extract_strided_slice %3 {offsets = [8, 0], sizes = [1, 128], strides = [1, 1]} : vector<16x128xf32> to vector<1x128xf32>
    %20 = arith.mulf %18, %19 : vector<1x128xf32>
    %21 = vector.extract_strided_slice %3 {offsets = [9, 0], sizes = [1, 128], strides = [1, 1]} : vector<16x128xf32> to vector<1x128xf32>
    %22 = arith.mulf %20, %21 : vector<1x128xf32>
    %23 = vector.extract_strided_slice %3 {offsets = [10, 0], sizes = [1, 128], strides = [1, 1]} : vector<16x128xf32> to vector<1x128xf32>
    %24 = arith.mulf %22, %23 : vector<1x128xf32>
    %25 = vector.extract_strided_slice %3 {offsets = [11, 0], sizes = [1, 128], strides = [1, 1]} : vector<16x128xf32> to vector<1x128xf32>
    %26 = arith.mulf %24, %25 : vector<1x128xf32>
    %27 = vector.extract_strided_slice %3 {offsets = [12, 0], sizes = [1, 128], strides = [1, 1]} : vector<16x128xf32> to vector<1x128xf32>
    %28 = arith.mulf %26, %27 : vector<1x128xf32>
    %29 = vector.extract_strided_slice %3 {offsets = [13, 0], sizes = [1, 128], strides = [1, 1]} : vector<16x128xf32> to vector<1x128xf32>
    %30 = arith.mulf %28, %29 : vector<1x128xf32>
    %31 = vector.extract_strided_slice %3 {offsets = [14, 0], sizes = [1, 128], strides = [1, 1]} : vector<16x128xf32> to vector<1x128xf32>
    %32 = arith.mulf %30, %31 : vector<1x128xf32>
    %33 = vector.extract_strided_slice %3 {offsets = [15, 0], sizes = [1, 128], strides = [1, 1]} : vector<16x128xf32> to vector<1x128xf32>
    %34 = arith.mulf %32, %33 : vector<1x128xf32>
    %c0_1 = arith.constant 0 : index
    %c0_2 = arith.constant 0 : index
    %35 = vector.load %arg2[%c0_1, %c0_2] : memref<32x16xf32, #tpu.memory_space<vmem>>, vector<32x16xf32>
    %c0_3 = arith.constant 0 : index
    %c0_4 = arith.constant 0 : index
    %36 = vector.load %arg3[%c0_3, %c0_4] : memref<32x1xf32, #tpu.memory_space<vmem>>, vector<32x1xf32>
    %cst_5 = arith.constant dense<0.000000e+00> : vector<32x128xf32>
    %37 = tpu.matmul %35, %0, %cst_5 {dimension_numbers = #tpu.dot_dimension_numbers<[1], [0], [0], [1], [0, 0, 1, 1], [], []>} : vector<32x16xf32>, vector<16x128xf32>, vector<32x128xf32> -> vector<32x128xf32>
    %38 = vector.broadcast %36 : vector<32x1xf32> to vector<32x128xf32>
    %39 = arith.addf %37, %38 : vector<32x128xf32>
    %cst_6 = arith.constant 0.000000e+00 : f32
    %40 = vector.broadcast %cst_6 : f32 to vector<32x128xf32>
    %41 = arith.maximumf %39, %40 : vector<32x128xf32>
    %c0_7 = arith.constant 0 : index
    %c0_8 = arith.constant 0 : index
    %42 = vector.load %arg4[%c0_7, %c0_8] : memref<32x32xf32, #tpu.memory_space<vmem>>, vector<32x32xf32>
    %c0_9 = arith.constant 0 : index
    %c0_10 = arith.constant 0 : index
    %43 = vector.load %arg5[%c0_9, %c0_10] : memref<32x1xf32, #tpu.memory_space<vmem>>, vector<32x1xf32>
    %cst_11 = arith.constant dense<0.000000e+00> : vector<32x128xf32>
    %44 = tpu.matmul %42, %41, %cst_11 {dimension_numbers = #tpu.dot_dimension_numbers<[1], [0], [0], [1], [0, 0, 1, 1], [], []>} : vector<32x32xf32>, vector<32x128xf32>, vector<32x128xf32> -> vector<32x128xf32>
    %45 = vector.broadcast %43 : vector<32x1xf32> to vector<32x128xf32>
    %46 = arith.addf %44, %45 : vector<32x128xf32>
    %cst_12 = arith.constant 0.000000e+00 : f32
    %47 = vector.broadcast %cst_12 : f32 to vector<32x128xf32>
    %48 = arith.maximumf %46, %47 : vector<32x128xf32>
    %c0_13 = arith.constant 0 : index
    %c0_14 = arith.constant 0 : index
    %49 = vector.load %arg6[%c0_13, %c0_14] : memref<8x32xf32, #tpu.memory_space<vmem>>, vector<8x32xf32>
    %c0_15 = arith.constant 0 : index
    %c0_16 = arith.constant 0 : index
    %50 = vector.load %arg7[%c0_15, %c0_16] : memref<8x1xf32, #tpu.memory_space<vmem>>, vector<8x1xf32>
    %cst_17 = arith.constant dense<0.000000e+00> : vector<8x128xf32>
    %51 = tpu.matmul %49, %48, %cst_17 {dimension_numbers = #tpu.dot_dimension_numbers<[1], [0], [0], [1], [0, 0, 1, 1], [], []>} : vector<8x32xf32>, vector<32x128xf32>, vector<8x128xf32> -> vector<8x128xf32>
    %52 = vector.broadcast %50 : vector<8x1xf32> to vector<8x128xf32>
    %53 = arith.addf %51, %52 : vector<8x128xf32>
    %54 = vector.broadcast %34 : vector<1x128xf32> to vector<8x128xf32>
    %55 = arith.mulf %54, %53 : vector<8x128xf32>
    %c0_18 = arith.constant 0 : index
    %c0_19 = arith.constant 0 : index
    %56 = vector.load %arg8[%c0_18, %c0_19] : memref<8x128xf32, #tpu.memory_space<vmem>>, vector<8x128xf32>
    tpu.vector_store %arg8[%c0_18, %c0_19], %55 {strides = array<i32>} : memref<8x128xf32, #tpu.memory_space<vmem>>, vector<8x128xf32>,
    return
  }
  func.func @transform_0(%arg0: i32) -> (i32, i32) {
    %c0_i32 = arith.constant 0 : i32
    %c0_i32_0 = arith.constant 0 : i32
    return %c0_i32, %arg0 : i32, i32
  }
  func.func @transform_1(%arg0: i32) -> (i32, i32) {
    %c0_i32 = arith.constant 0 : i32
    %c0_i32_0 = arith.constant 0 : i32
    %c0_i32_1 = arith.constant 0 : i32
    return %c0_i32, %c0_i32_0 : i32, i32
  }
  func.func @transform_2(%arg0: i32) -> (i32, i32) {
    %c0_i32 = arith.constant 0 : i32
    %c0_i32_0 = arith.constant 0 : i32
    %c0_i32_1 = arith.constant 0 : i32
    return %c0_i32, %c0_i32_0 : i32, i32
  }
  func.func @transform_3(%arg0: i32) -> (i32, i32) {
    %c0_i32 = arith.constant 0 : i32
    %c0_i32_0 = arith.constant 0 : i32
    %c0_i32_1 = arith.constant 0 : i32
    return %c0_i32, %c0_i32_0 : i32, i32
  }
  func.func @transform_4(%arg0: i32) -> (i32, i32) {
    %c0_i32 = arith.constant 0 : i32
    %c0_i32_0 = arith.constant 0 : i32
    %c0_i32_1 = arith.constant 0 : i32
    return %c0_i32, %c0_i32_0 : i32, i32
  }
  func.func @transform_5(%arg0: i32) -> (i32, i32) {
    %c0_i32 = arith.constant 0 : i32
    %c0_i32_0 = arith.constant 0 : i32
    %c0_i32_1 = arith.constant 0 : i32
    return %c0_i32, %c0_i32_0 : i32, i32
  }
  func.func @transform_6(%arg0: i32) -> (i32, i32) {
    %c0_i32 = arith.constant 0 : i32
    %c0_i32_0 = arith.constant 0 : i32
    %c0_i32_1 = arith.constant 0 : i32
    return %c0_i32, %c0_i32_0 : i32, i32
  }
  func.func @transform_7(%arg0: i32) -> (i32, i32) {
    %c0_i32 = arith.constant 0 : i32
    %c0_i32_0 = arith.constant 0 : i32
    return %c0_i32, %arg0 : i32, i32
  }
}

</mosaic_0001>

<bundles_post_ra>
// kernel: tpu_custom_call.1
= control target key start
LH: loop header
LB: loop body
LE: loop exit
PB: predicated region body
PF: predicated region fallthrough
CT: control target
= control target key end

     0   :  { %12 = vsyncpa [#allocation4], 0  ;;  %s1216_s0 = inlined_call_operand.vmem [shape: f32[16,256], index: 0, kind: input, shape index: {}]   ;;  %s1217_s1 = inlined_call_operand.vmem [shape: f32[32,16], index: 1, kind: input, shape index: {}]   ;;  %s1218_s2 = inlined_call_operand.vmem [shape: f32[32,1], index: 2, kind: input, shape index: {}]   ;;  %s1219_s3 = inlined_call_operand.vmem [shape: f32[32,32], index: 3, kind: input, shape index: {}]   ;;  %s1220_s4 = inlined_call_operand.vmem [shape: f32[32,1], index: 4, kind: input, shape index: {}]   ;;  %s1221_s5 = inlined_call_operand.vmem [shape: f32[8,32], index: 5, kind: input, shape index: {}]   ;;  %s1222_s6 = inlined_call_operand.vmem [shape: f32[8,1], index: 6, kind: input, shape index: {}]   ;;  %s1223_s7 = inlined_call_operand.hbm [shape: f32[8,256], index: 7, kind: output, shape index: {}]  }
   0x1   :  { %14 = vsyncpa [#allocation4 + $0x1], 0  ;;  %s1038_s24 = smov 0   ;;  %s1040_s25 = smov 0  }
   0x2   :  { %s1042_s26 = smov 0   ;;  %s1044_s27 = smov 0  }
   0x3 LB: > { %s790_s28 = sadd.s32 4294967295, %s991_s27   ;;  %s791_s29 = sadd.s32 4294967294, %s991_s27   ;;  %s991_s27 = sphi %s1044_s27, %s1229_s27   ;;  %s987_s26 = sphi %s1042_s26, %s1228_s26   ;;  %s983_s25 = sphi %s1040_s25, %s1227_s25   ;;  %s979_s24 = sphi %s1038_s24, %s1226_s24  }
   0x4   : > { %s1061_s30 = sadd.s32 1, %s991_s27   ;;  %s27_s8 = sadd.s32 1, %s987_s26 }
   0x5   : > { %s24_s9 = ssub.s32 %s991_s27, %s1061_s30  ;;  %p34_p0 = scmp.ne.s32.totalorder %s987_s26, %s983_s25 }
   0x6   : > { %p25_p1 = scmp.eq.s32.totalorder %s24_s9, 0  ;;  %p35_p2 = scmp.eq.s32.totalorder %s991_s27, 0 }
   0x7   : > { %p190_p3 = scmp.eq.s32.totalorder %s790_s28, 1  ;;  %p195_p4 = scmp.ne.s32.totalorder %s983_s25, %s979_s24 }
   0x8   : > { %s1074_s10 = scalar_select %p25_p1, %s987_s26, %s27_s8  }
   0x9   : > { %p36_p5 = por %p35_p2, %p34_p0  ;;  %p1076_p6 = por %p190_p3, %p34_p0 }
   0xa   : > { %p196_p7 = scmp.eq.s32.totalorder %s791_s29, 1  ;;  %p793_p9 = scmp.ge.s32.totalorder %s991_s27, 2 }
   0xc   : > { %p1080_p8 = por %p196_p7, %p195_p4  ;;  %230 = sbr.rel (%p793_p9) target bundleno = 26 (0x1a), region = 40 }
  0x13   : > { %233 = sbr.rel (!%p36_p5) target bundleno = 26 (0x1a), region = 44  ;;  %s235_s13 = sand.u32 (%p36_p5), 1, %s987_s26  }
  0x14   : > { %s795_s14 = sshll.u32 (%p36_p5), %s991_s27, 3  ;;  %s794_s15 = sshll.u32 (%p36_p5), %s235_s13, 4 }
  0x15   : > { %s239_s18 = scalar_lea.vmem (%p36_p5), %s1216_s0, %s795_s14  ;;  %s237_s19 = scalar_lea.vmem (%p36_p5), [#allocation2], %s794_s15 }
  0x16   : > { %v269_v0 = vld [vmem:[%s239_s18] sm:$0xff] (%p36_p5)  ;;  %v271_v1 = vld [vmem:[%s239_s18 + $0x10] sm:$0xff] (%p36_p5) }
  0x17   : > { %270 = vst [vmem:[%s237_s19] sm:$0xff] (%p36_p5), %v269_v0  ;;  %272 = vst [vmem:[%s237_s19 + $0x8] sm:$0xff] (%p36_p5), %v271_v1 }
  0x1a PF: > { %p796_p10 = scmp.ge.s32.totalorder %s991_s27, 1  ;;  %p277_p11 = scmp.lt.s32.totalorder %s991_s27, 3 }
  0x1c   : > { %p278_p12 = pnand %p796_p10, %p277_p11 }
  0x1d   : > { %s1095_s20 = sand.u32 (!%p278_p12), 1, %s983_s25   ;;  %v366_v2 = vld [vmem:[%s1217_s1] sm:$0xff] (!%p278_p12)  ;;  %vm394_vm0 = vcmask (!%p278_p12), 130048   ;;  %v993_v3 = vmov (!%p278_p12), 0   ;;  %v372_v5 = vld [vmem:[%s1218_s2 + $0x10] sm:$0xff] (!%p278_p12)  ;;  %v371_v8 = vld [vmem:[%s1218_s2 + $0x8] sm:$0xff] (!%p278_p12) }
  0x1e   : > { %281 = sbr.rel (%p278_p12) target bundleno = 722 (0x2d2), region = 82  ;;  %s797_s23 = sshll.u32 (!%p278_p12), %s1095_s20, 4  ;;  %835 = vmatprep.mubr.msk.f32.mxu0 (!%p278_p12), %vm394_vm0, %v366_v2  ;;  %927 = vset.pattern.permute.xlu0 (!%p278_p12), %v993_v3  ;;  %v370_v4 = vld [vmem:[%s1218_s2] sm:$0xff] (!%p278_p12)  ;;  %v373_v10 = vld [vmem:[%s1218_s2 + $0x18] sm:$0xff] (!%p278_p12)  ;;  %v367_v11 = vld [vmem:[%s1217_s1 + $0x8] sm:$0xff] (!%p278_p12)  ;;  %vm524_vm1 = vcmask (!%p278_p12), 261120  }
  0x1f   : > { %376 = vperm.xlu0 (!%p278_p12), %927, %v370_v4   ;;  %928 = vset.pattern.permute.xlu1 (!%p278_p12), %v993_v3  ;;  %s286_s14 = scalar_lea.vmem (!%p278_p12), [#allocation2], %s797_s23  ;;  %v500_v12 = vld [vmem:[%s1220_s4] sm:$0xff] (!%p278_p12)  ;;  %v368_v13 = vld [vmem:[%s1217_s1 + $0x10] sm:$0xff] (!%p278_p12)  ;;  %v501_v14 = vld [vmem:[%s1220_s4 + $0x8] sm:$0xff] (!%p278_p12)  ;;  %v994_v42 = vmov (!%p278_p12), 0.0|0.0   ;;  %vm995_vm2 = vmmov (!%p278_p12), 0  }
  0x20   : > { %v315_v6 = vld [vmem:[%s286_s14] sm:$0xff] (!%p278_p12)  ;;  %v1108_v7 = vld [vmem:[%s286_s14 + $0x8] sm:$0xff] (!%p278_p12)  ;;  %386 = vperm.xlu1 (!%p278_p12), %928, %v372_v5   ;;  %v996_v44 = vmov (!%p278_p12), 0.0   ;;  %s798_s19 = sshll.u32 (!%p278_p12), %s1095_s20, 3  ;;  %s809_s21 = sshll.u32 (!%p278_p12), %s790_s28, 7 }
  0x21   : > { %v866_v9 = vpack.c.bf16 (!%p278_p12), %v1108_v7, %v315_v6  ;;  %v369_v15 = vld [vmem:[%s1217_s1 + $0x18] sm:$0xff] (!%p278_p12)  ;;  %v502_v16 = vld [vmem:[%s1220_s4 + $0x10] sm:$0xff] (!%p278_p12)  ;;  %v627_v18 = vld [vmem:[%s1222_s6] sm:$0xff] (!%p278_p12)  ;;  %v317_v41 = vsub.f32 (!%p278_p12), 1.0, %v315_v6  ;;  %v318_v51 = vsub.f32 (!%p278_p12), 1.0, %v1108_v7  ;;  %s314_s22 = scalar_lea.vmem (!%p278_p12), [#allocation3], %s798_s19  ;;  %s1172_s9 = scalar_lea.hbm (!%p278_p12), %s1223_s7, %s809_s21 }
  0x22   : > { %v503_v17 = vld [vmem:[%s1220_s4 + $0x18] sm:$0xff] (!%p278_p12)  ;;  %v496_v19 = vld [vmem:[%s1219_s3] sm:$0xff] (!%p278_p12)  ;;  %v497_v38 = vld [vmem:[%s1219_s3 + $0x8] sm:$0xff] (!%p278_p12)  ;;  %s726_s23 = sshll.u32 (!%p278_p12), %s314_s22, 4  ;;  %s713_s13 = scalar_lea.sflag (!%p278_p12), [#allocation4], %s1095_s20  ;;  %s1174_s23 = int_to_ptr.vmem [resolvable:$true] %s726_s23 }
  0x23   : > { %867 = vmatprep.subr.bf16.mxu0 (!%p278_p12), %v866_v9  ;;  %381 = vperm.xlu0 (!%p278_p12), %927, %v371_v8   ;;  %v498_v39 = vld [vmem:[%s1219_s3 + $0x10] sm:$0xff] (!%p278_p12)  ;;  %v499_v40 = vld [vmem:[%s1219_s3 + $0x18] sm:$0xff] (!%p278_p12)  ;;  %v319_v43 = vmul.f32 (!%p278_p12), %v317_v41, %v315_v6  ;;  %v320_v56 = vmul.f32 (!%p278_p12), %v318_v51, %v1108_v7  ;;  %s929_s14 = scalar_lea.vmem (!%p278_p12), %s1174_s23, 128  ;;  %s997_s28 = smov (!%p278_p12), [#allocation3]  }
  0x24   : > { %869 = vmatpush3.bf16.msra.mxu0 (!%p278_p12), %v866_v9  ;;  %391 = vperm.xlu1 (!%p278_p12), %928, %v373_v10   ;;  %p930_p13 = scmp.ne.s32.totalorder (!%p278_p12), %s1174_s23, %s929_s14  ;;  %s933_s15 = sshll.u32 (!%p278_p12), %s997_s28, 4  ;;  %s934_s15 = int_to_ptr.vmem [resolvable:$false] %s933_s15 }
  0x25   : > { %849 = vmatprep.mubr.msk.f32.mxu1 %vm524_vm1, %v496_v19  ;;  %878 = vmatprep.subr.bf16.mxu0 %v994_v42  ;;  %v322_v45 = vrot.slane %v319_v43, 1  ;;  %v325_v46 = vrot.slane %v319_v43, 2  ;;  %v328_v48 = vrot.slane %v319_v43, 3  ;;  %v331_v50 = vrot.slane %v319_v43, 4  ;;  %s935_s16 = scalar_lea.vmem %s934_s15, 256  ;;  %p936_p2 = scmp.lt.s32.totalorder %s1174_s23, %s934_s15 }
  0x26   : > { %v334_v53 = vrot.slane %v319_v43, 5  ;;  %v337_v55 = vrot.slane %v319_v43, 6  ;;  %v340_v58 = vrot.slane %v319_v43, 7  ;;  %v345_v61 = vrot.slane %v320_v56, 1  ;;  %p931_p0 = pnand %p930_p13, %p1076_p6  ;;  %p937_p3 = scmp.lt.s32.totalorder %s935_s16, %s929_s14 }
  0x27   : > { %836 = vmatmul.mubr.msk.f32.vlgmr.msra.gmra.mrb[0].mxu0 %vm394_vm0, %v367_v11  ;;  %506 = vperm.xlu0 %927, %v500_v12   ;;  %v324_v47 = vmul.f32 %v322_v45, %v319_v43  ;;  %v348_v63 = vrot.slane %v320_v56, 2  ;;  %v351_v1 = vrot.slane %v320_v56, 3  ;;  %v354_v3 = vrot.slane %v320_v56, 4 }
  0x28   : > { %838 = vmatprep.mubr.msk.f32.mxu0 %vm394_vm0, %v368_v13  ;;  %511 = vperm.xlu1 %928, %v501_v14   ;;  %v357_v5 = vrot.slane %v320_v56, 5  ;;  %v360_v8 = vrot.slane %v320_v56, 6  ;;  %v363_v10 = vrot.slane %v320_v56, 7  ;;  %p932_p1 = pneg %p931_p0  ;;  %p938_p4 = por %p937_p3, %p936_p2 }
  0x29   : > { %v327_v49 = vmul.f32 %v325_v46, %v324_v47 }
  0x2a   : > { %p939_p5 = pnand %p938_p4, %p932_p1 }
  0x2b   : > { %839 = vmatmul.mubr.msk.f32.gmra.mrb[2].mxu0 %vm394_vm0, %v369_v15  ;;  %516 = vperm.xlu0 %927, %v502_v16   ;;  %v330_v52 = vmul.f32 %v328_v48, %v327_v49 }
  0x2c   : > { %521 = vperm.xlu1 %928, %v503_v17   ;;  %863 = vmatprep.mubr.msk.f32.mxu0 %vm995_vm2, %v996_v44 }
  0x2d   : > { %v333_v54 = vmul.f32 %v331_v50, %v330_v52 }
  0x2f   : > { %630 = vperm.xlu0 %927, %v627_v18   ;;  %v336_v57 = vmul.f32 %v334_v53, %v333_v54 }
  0x31   : > { %v339_v59 = vmul.f32 %v337_v55, %v336_v57 }
  0x33   : > { %v342_v60 = vmul.f32 %v340_v58, %v339_v59 }
  0x35   : > { %v343_v62 = vmul.f32 %v342_v60, %v320_v56 }
  0x37   : > { %v347_v0 = vmul.f32 %v345_v61, %v343_v62 }
  0x39   : > { %v350_v2 = vmul.f32 %v348_v63, %v347_v0 }
  0x3b   : > { %v353_v4 = vmul.f32 %v351_v1, %v350_v2 }
  0x3d   : > { %v356_v6 = vmul.f32 %v354_v3, %v353_v4 }
  0x3f   : > { %v359_v9 = vmul.f32 %v357_v5, %v356_v6 }
  0x41   : > { %v362_v11 = vmul.f32 %v360_v8, %v359_v9 }
  0x43   : > { %v365_v12 = vmul.f32 %v363_v10, %v362_v11 }
  0x9e   : > { %v377_v20 = vpop.permute.xlu0 %376 }
  0x9f   : > { %v387_v21 = vpop.permute.xlu1 %386 }
  0xa2   : > { %v382_v22 = vpop.permute.xlu0 %381 }
  0xa3   : > { %v392_v28 = vpop.permute.xlu1 %391 }
  0xa6   : > { %v507_v13 = vpop.permute.xlu0 %506 }
  0xa7   : > { %v512_v7 = vpop.permute.xlu1 %511 }
  0xab   : > { %v522_v19 = vpop.permute.xlu1 %521 }
  0xfa   : > { %v837_v23 = vpop.f32.mrb[0].mxu0 }
  0xfb   : > { %v479_v24 = vadd.f32 %v837_v23, %v382_v22  ;;  %v473_v25 = vpop.f32.mrb[1].mxu0  ;;  %v517_v22 = vpop.permute.xlu0 %516 }
  0xfc   : > { %v474_v26 = vadd.f32 %v473_v25, %v377_v20 }
  0xfd   : > { %v493_v27 = vmax.f32 %v479_v24, 0.0 }
  0xfe   : > { %v492_v29 = vmax.f32 %v474_v26, 0.0  ;;  %v840_v30 = vpop.f32.mrb[2].mxu0 }
  0xff   : > { %v489_v31 = vadd.f32 %v840_v30, %v392_v28  ;;  %v483_v32 = vpop.f32.mrb[3].mxu0  ;;  %v626_v30 = vld [vmem:[%s1221_s5] sm:$0xff] }
 0x100   : > { %v484_v33 = vadd.f32 %v483_v32, %v387_v21  ;;  %v870_v34 = vpack.c.bf16 %v493_v27, %v492_v29 }
 0x101   : > { %v495_v35 = vmax.f32 %v489_v31, 0.0  ;;  %v706_v31 = vlaneseq }
 0x102   : > { %v494_v36 = vmax.f32 %v484_v33, 0.0  ;;  %871 = vmatprep.subr.bf16.mxu1 %v870_v34 }
 0x103   : > { %873 = vmatpush3.bf16.msra.mxu1 %v870_v34  ;;  %v707_v32 = vshrl.u32 %v706_v31, 7 }
 0x104   : > { %v874_v37 = vpack.c.bf16 %v495_v35, %v494_v36  ;;  %v631_v35 = vpop.permute.xlu0 %630 }
 0x105   : > { %v708_v33 = vsub.s32 0, %v707_v32 }
 0x106   : > { %875 = vmatprep.subr.bf16.mxu1 %v874_v37 }
 0x107   : > { %877 = vmatpush3.bf16.msra.mxu1 %v874_v37  ;;  %v709_v34 = vrot.slane %v365_v12, %v708_v33 }
 0x10a   : > { %850 = vmatmul.mubr.msk.f32.vlgmr.msra.gmra.mrb[0].mxu1 %vm524_vm1, %v497_v38 }
 0x10b   : > { %852 = vmatprep.mubr.msk.f32.mxu1 %vm524_vm1, %v498_v39 }
 0x10e   : > { %853 = vmatmul.mubr.msk.f32.gmra.mrb[2].mxu1 %vm524_vm1, %v499_v40 }
 0x1dd   : > { %v851_v14 = vpop.f32.mrb[0].mxu1 }
 0x1de   : > { %v609_v15 = vadd.f32 %v851_v14, %v512_v7  ;;  %v603_v16 = vpop.f32.mrb[1].mxu1 }
 0x1df   : > { %v604_v17 = vadd.f32 %v603_v16, %v507_v13 }
 0x1e0   : > { %v623_v18 = vmax.f32 %v609_v15, 0.0 }
 0x1e1   : > { %v622_v20 = vmax.f32 %v604_v17, 0.0  ;;  %v854_v21 = vpop.f32.mrb[2].mxu1 }
 0x1e2   : > { %v619_v23 = vadd.f32 %v854_v21, %v522_v19  ;;  %v613_v24 = vpop.f32.mrb[3].mxu1 }
 0x1e3   : > { %v879_v25 = vpack.c.bf16 %v623_v18, %v622_v20  ;;  %v614_v26 = vadd.f32 %v613_v24, %v517_v22 }
 0x1e4   : > { %v625_v27 = vmax.f32 %v619_v23, 0.0 }
 0x1e5   : > { %v624_v28 = vmax.f32 %v614_v26, 0.0  ;;  %880 = vmatpush3.bf16.msra.mxu0 %v879_v25 }
 0x1e6   : > { %881 = vmatprep.subr.bf16.mxu0 %v994_v42 }
 0x1e7   : > { %v882_v29 = vpack.c.bf16 %v625_v27, %v624_v28 }
 0x1e9   : > { %883 = vmatpush3.bf16.msra.mxu0 %v882_v29 }
 0x1ec   : > { %864 = vmatmul.mubr.msk.f32.vlgmr.msra.gmra.mrb[4].mxu0 %vm524_vm1, %v626_v30 }
 0x2bf   : > { %v702_v36 = vpop.f32.mrb[4].mxu0 }
 0x2c0   : > { %v703_v37 = vadd.f32 %v702_v36, %v631_v35  ;;  %v865_v38 = vpop.f32.mrb[5].mxu0 }
 0x2c2   : > { %v710_v39 = vmul.f32 %v709_v34, %v703_v37 }
 0x2c4   : > { %711 = vst [vmem:[%s314_s22] sm:$0xff] %v710_v39 }
 0x2c5   : > { %942 = shalt.err (!%p939_p5)
}
 0x2c6   : > { %s943_s20 = scalar_lea.hbm %s1172_s9, 128  ;;  %s947_s19 = scalar_lea.hbm %s1223_s7, 256 }
 0x2c7   : > { %p944_p7 = scmp.ne.s32.totalorder %s1172_s9, %s943_s20  ;;  %p948_p12 = scmp.lt.u32.totalorder %s1172_s9, %s1223_s7 }
 0x2c8   : > { %p949_p13 = scmp.lt.u32.totalorder %s947_s19, %s943_s20  ;;  %p951_p1 = scmp.lt.u32.totalorder %s943_s20, %s1172_s9 }
 0x2c9   : > { %p945_p10 = pnand %p944_p7, %p1076_p6 }
 0x2ca   : > { %p950_p0 = por %p949_p13, %p948_p12 }
 0x2cb   : > { %p946_p11 = pneg %p945_p10 }
 0x2cc   : > { %p952_p2 = por %p951_p1, %p950_p0 }
 0x2ce   : > { %p953_p3 = pnand %p952_p2, %p946_p11 }
 0x2d0   : > { %956 = shalt.err (!%p953_p3)
}
 0x2d1   : > { %884 = dma.vmem_to_hbm [thread:$0]  (%p1076_p6), %s1174_s23, 128, %s1172_s9, %s713_s13  }
 0x2d2 PF: > { %s738_s29 = sand.u32 1, %s979_s24   ;;  %p887_p4 = pnand %p793_p9, %p1080_p8 }
 0x2d3   : > { %s739_s8 = scalar_lea.sflag [#allocation4], %s738_s29 }
 0x2d4   : > { %974 = dma.done.wait (!%p887_p4), %s739_s8, 128  }
 0x2d5   : > { %976 = vsyncadd (!%p887_p4), %s739_s8, 4294967168  ;;  %p17_p5 = scmp.ge.s32.totalorder %s1061_s30, 4   ;;  %s1226_s24 = smov %s983_s25 }
 0x2d6   : > { %s1227_s25 = smov %s987_s26  ;;  %s1228_s26 = smov %s1074_s10 }
 0x2d7   : > { %s1229_s27 = smov %s1061_s30  ;;  %19 = sbr.rel (!%p17_p5) target bundleno = 3 (0x3), region = 126 }
 0x2de   :  { %744 = vsyncpa [#allocation4], 1 }
 0x2df   :  { %746 = vsyncpa [#allocation4 + $0x1], 1 }

</bundles_post_ra>
